<compile_context>
chip_gen: v5e
topology: v5e:2x2
jax: 0.10.0
libtpu: 0.0.40
codegen_flags: <defaults>
</compile_context>

<pallas_src>
import functools

import jax
import jax.numpy as jnp
from jax.experimental import pallas as pl
from jax.experimental.pallas import tpu as pltpu

INPUT_NODES = 7     # param['Input nodes']
HIDDEN_NODES = 6    # param['Hidden nodes']
OUTPUT_NODES = 1    # param['Output node']

F_PAD = 8           # 7 lag features padded to 8 sublanes
HID_PAD = 8         # 6 hidden units padded to 8 sublanes
LANE = 128          # TPU lane width


def _mlp_kernel(xt_ref, w1t_ref, b1_ref, w2_ref, b2_ref, o_ref):
    # xt_ref : (F_PAD, TB)   features on sublanes (row 7 = 0), batch on lanes
    # w1t_ref: (HID_PAD, F_PAD)  W1^T, rows >= 6 and cols >= 7 are zero
    # b1_ref : (HID_PAD, 1)      b1 column, rows >= 6 are zero
    # w2_ref : (HID_PAD, 1)      W2 column, rows >= 6 are zero
    # b2_ref : (1, 1) in SMEM
    # o_ref  : (1, TB)           lane-dense output row
    h = jnp.tanh(
        jnp.dot(w1t_ref[...], xt_ref[...], preferred_element_type=jnp.float32)
        + b1_ref[...]
    )                                                   # (HID_PAD, TB)
    # Layer 2: VPU broadcast-mul + sublane (XLU) reduction -> (1, TB)
    y = jnp.sum(h * w2_ref[...], axis=0, keepdims=True) + b2_ref[0, 0]
    o_ref[...] = y


def prepare_nn_forecaster_params(w1, b1, w2, b2):
    """One-time (model-init) padding of the 7->6->1 MLP parameters.

    w1: (7, 6), b1: (6,), w2: (6, 1), b2: (1,)
    Returns (w1t_p (8, 8) = padded W1^T, b1_p (8, 1), w2_p (8, 1), b2_p (1, 1)).
    """
    f32 = jnp.float32
    w1t_p = jnp.zeros((HID_PAD, F_PAD), f32)
    w1t_p = w1t_p.at[:HIDDEN_NODES, :INPUT_NODES].set(w1.astype(f32).T)
    b1_p = jnp.zeros((HID_PAD, 1), f32)
    b1_p = b1_p.at[:HIDDEN_NODES, 0].set(b1.astype(f32))
    w2_p = jnp.zeros((HID_PAD, 1), f32)
    w2_p = w2_p.at[:HIDDEN_NODES, 0].set(w2.astype(f32).reshape(-1))
    b2_p = b2.astype(f32).reshape(1, 1)
    return w1t_p, b1_p, w2_p, b2_p


def _forward_xla(x, w1t_p, b1_p, w2_p, b2_p):
    """Small-batch fallback: same math, fused by XLA, no pallas_call overhead."""
    xf = x.astype(jnp.float32)
    h = jnp.tanh(xf @ w1t_p[:, :INPUT_NODES].T + b1_p[:, 0][None, :])   # (B, 8)
    return h @ w2_p + b2_p                                              # (B, 1)


def _forward_pallas(xt, w1t_p, b1_p, w2_p, b2_p, block_b):
    """Pallas path. xt: (F_PAD, B) feature-major activations. Returns (1, B)."""
    _, B = xt.shape

    # Batch tile (lanes): multiple of 128, at most block_b, and capped so that
    # n_tiles >= 2 whenever B > 128 (keeps both v7x TensorCores busy).
    block_b = max(LANE, (int(block_b) // LANE) * LANE)
    half_tiles = -(-B // (2 * LANE))          # ceil(B / 256)
    tb_cap = max(LANE, half_tiles * LANE)
    tb = min(block_b, tb_cap)
    n_tiles = -(-B // tb)

    cost = pl.CostEstimate(
        flops=2 * B * HID_PAD * F_PAD + 3 * B * HID_PAD,
        transcendentals=B * HID_PAD,
        bytes_accessed=4 * (xt.size + w1t_p.size + b1_p.size + w2_p.size
                            + b2_p.size + B),
    )

    out = pl.pallas_call(
        _mlp_kernel,
        out_shape=jax.ShapeDtypeStruct((1, B), jnp.float32),
        grid_spec=pltpu.PrefetchScalarGridSpec(
            num_scalar_prefetch=0,
            grid=(n_tiles,),
            in_specs=[
                pl.BlockSpec((F_PAD, tb), lambda i: (0, i)),      # x^T tile
                pl.BlockSpec((HID_PAD, F_PAD), lambda i: (0, 0)), # W1^T (resident)
                pl.BlockSpec((HID_PAD, 1), lambda i: (0, 0)),     # b1   (resident)
                pl.BlockSpec((HID_PAD, 1), lambda i: (0, 0)),     # W2   (resident)
                pl.BlockSpec(memory_space=pltpu.MemorySpace.SMEM),  # b2 scalar
            ],
            out_specs=pl.BlockSpec((1, tb), lambda i: (0, i)),    # lane-dense row
        ),
        compiler_params=pltpu.CompilerParams(
            dimension_semantics=("parallel",)),
        cost_estimate=cost,
    )(xt, w1t_p, b1_p, w2_p, b2_p)
    return out


@functools.partial(jax.jit, static_argnames=("block_b", "use_pallas"))
def nn_forecaster_forward(x, w1t_p, b1_p, w2_p, b2_p, block_b=2048,
                          use_pallas=None):
    """Forward pass: y = tanh(x @ W1 + b1) @ W2 + b2.

    x : (B, INPUT_NODES) float32 (standardized lag features, batch-major).
    w1t_p, b1_p, w2_p, b2_p: pre-padded params from prepare_nn_forecaster_params.
    Returns (B, OUTPUT_NODES) float32.
    """
    B = x.shape[0]
    if use_pallas is None:
        use_pallas = B >= 1024   # tiny batches: pallas dispatch overhead dominates

    if not use_pallas:
        return _forward_xla(x, w1t_p, b1_p, w2_p, b2_p)

    # Per-call glue: batch-major -> feature-major (batch on lanes).  This is the
    # only activation copy; a pipeline that already emits lag features as
    # (features, batch) can feed _forward_pallas directly and skip it.
    xt = jnp.zeros((F_PAD, B), jnp.float32)
    xt = xt.at[:INPUT_NODES, :].set(x.astype(jnp.float32).T)

    out = _forward_pallas(xt, w1t_p, b1_p, w2_p, b2_p, block_b)   # (1, B)
    return out.reshape(B, OUTPUT_NODES)


if __name__ == "__main__":
    key = jax.random.PRNGKey(0)
    k_x, k_w1, k_b1, k_w2, k_b2 = jax.random.split(key, 5)

    B = 300  # small batch of standardized lag-feature rows (2 tiles, 1 partial)
    x = jax.random.normal(k_x, (B, INPUT_NODES), dtype=jnp.float32)

    # 'Initialisation of weights': 'N(0,1)'
    w1 = jax.random.normal(k_w1, (INPUT_NODES, HIDDEN_NODES), dtype=jnp.float32)
    b1 = jax.random.normal(k_b1, (HIDDEN_NODES,), dtype=jnp.float32)
    w2 = jax.random.normal(k_w2, (HIDDEN_NODES, OUTPUT_NODES), dtype=jnp.float32)
    b2 = jax.random.normal(k_b2, (OUTPUT_NODES,), dtype=jnp.float32)

    # Init-time padding (hoisted out of the per-call forward).
    params = prepare_nn_forecaster_params(w1, b1, w2, b2)
    params = jax.block_until_ready(params)

    # Pallas kernel path (forced so the kernel runs even at this small B).
    y = nn_forecaster_forward(x, *params, use_pallas=True)
    y = jax.block_until_ready(y)

    # Auto-dispatch small-batch fallback path.
    y_small = nn_forecaster_forward(x[:8], *params)
    y_small = jax.block_until_ready(y_small)

    # Pure-JAX reference of the forward semantics.
    y_ref = jnp.tanh(x @ w1 + b1[None, :]) @ w2 + b2[None, :]
    assert y.shape == (B, OUTPUT_NODES)
    assert jnp.allclose(y, y_ref, atol=1e-4, rtol=1e-4)
    assert jnp.allclose(y_small, y_ref[:8], atol=1e-4, rtol=1e-4)

    print("KERNEL_OK")
</pallas_src>

<mosaic_0001>
module attributes {stable_mosaic.version = 11 : i64} {
  func.func @_mlp_kernel(%arg0: i32, %arg1: memref<8x256xf32, #tpu.memory_space<vmem>>, %arg2: memref<8x8xf32, #tpu.memory_space<vmem>>, %arg3: memref<8x1xf32, #tpu.memory_space<vmem>>, %arg4: memref<8x1xf32, #tpu.memory_space<vmem>>, %arg5: memref<1x1xf32, #tpu.memory_space<smem>>, %arg6: memref<1x256xf32, #tpu.memory_space<vmem>>) attributes {dimension_semantics = [#tpu.dimension_semantics<parallel>], iteration_bounds = array<i64: 2>, scalar_prefetch = 0 : i64, scratch_operands = 0 : i64, tpu.core_type = #tpu.core_type<tc>, window_params = [{transform_indices = @transform_0, window_bounds = array<i64: 8, 256>}, {pipeline_mode = #tpu.pipeline_mode<synchronous>, transform_indices = @transform_1, window_bounds = array<i64: 8, 8>}, {pipeline_mode = #tpu.pipeline_mode<synchronous>, transform_indices = @transform_2, window_bounds = array<i64: 8, 1>}, {pipeline_mode = #tpu.pipeline_mode<synchronous>, transform_indices = @transform_3, window_bounds = array<i64: 8, 1>}, {transform_indices = @transform_4, window_bounds = array<i64: 1, 1>}, {transform_indices = @transform_5, window_bounds = array<i64: 1, 256>}]} {
    %c0 = arith.constant 0 : index
    %c0_0 = arith.constant 0 : index
    %0 = vector.load %arg2[%c0, %c0_0] : memref<8x8xf32, #tpu.memory_space<vmem>>, vector<8x8xf32>
    %c0_1 = arith.constant 0 : index
    %c0_2 = arith.constant 0 : index
    %1 = vector.load %arg1[%c0_1, %c0_2] : memref<8x256xf32, #tpu.memory_space<vmem>>, vector<8x256xf32>
    %cst = arith.constant dense<0.000000e+00> : vector<8x256xf32>
    %2 = tpu.matmul %0, %1, %cst {dimension_numbers = #tpu.dot_dimension_numbers<[1], [0], [0], [1], [0, 0, 1, 1], [], []>} : vector<8x8xf32>, vector<8x256xf32>, vector<8x256xf32> -> vector<8x256xf32>
    %c0_3 = arith.constant 0 : index
    %c0_4 = arith.constant 0 : index
    %3 = vector.load %arg3[%c0_3, %c0_4] : memref<8x1xf32, #tpu.memory_space<vmem>>, vector<8x1xf32>
    %4 = vector.broadcast %3 : vector<8x1xf32> to vector<8x256xf32>
    %5 = arith.addf %2, %4 : vector<8x256xf32>
    %6 = math.tanh %5 : vector<8x256xf32>
    %c0_5 = arith.constant 0 : index
    %c0_6 = arith.constant 0 : index
    %7 = vector.load %arg4[%c0_5, %c0_6] : memref<8x1xf32, #tpu.memory_space<vmem>>, vector<8x1xf32>
    %8 = vector.broadcast %7 : vector<8x1xf32> to vector<8x256xf32>
    %9 = arith.mulf %6, %8 : vector<8x256xf32>
    %cst_7 = arith.constant dense<0.000000e+00> : vector<256xf32>
    %10 = vector.multi_reduction <add>, %9, %cst_7 [0] : vector<8x256xf32> to vector<256xf32>
    %11 = vector.shape_cast %10 : vector<256xf32> to vector<1x256xf32>
    %c0_8 = arith.constant 0 : index
    %c0_9 = arith.constant 0 : index
    %12 = memref.load %arg5[%c0_8, %c0_9] : memref<1x1xf32, #tpu.memory_space<smem>>
    %13 = vector.broadcast %12 : f32 to vector<1x256xf32>
    %14 = arith.addf %11, %13 : vector<1x256xf32>
    %c0_10 = arith.constant 0 : index
    %c0_11 = arith.constant 0 : index
    %15 = vector.load %arg6[%c0_10, %c0_11] : memref<1x256xf32, #tpu.memory_space<vmem>>, vector<1x256xf32>
    tpu.vector_store %arg6[%c0_10, %c0_11], %14 {strides = array<i32>} : memref<1x256xf32, #tpu.memory_space<vmem>>, vector<1x256xf32>,
    return
  }
  func.func @transform_0(%arg0: i32) -> (i32, i32) {
    %c0_i32 = arith.constant 0 : i32
    %c0_i32_0 = arith.constant 0 : i32
    return %c0_i32, %arg0 : i32, i32
  }
  func.func @transform_1(%arg0: i32) -> (i32, i32) {
    %c0_i32 = arith.constant 0 : i32
    %c0_i32_0 = arith.constant 0 : i32
    %c0_i32_1 = arith.constant 0 : i32
    return %c0_i32, %c0_i32_0 : i32, i32
  }
  func.func @transform_2(%arg0: i32) -> (i32, i32) {
    %c0_i32 = arith.constant 0 : i32
    %c0_i32_0 = arith.constant 0 : i32
    %c0_i32_1 = arith.constant 0 : i32
    return %c0_i32, %c0_i32_0 : i32, i32
  }
  func.func @transform_3(%arg0: i32) -> (i32, i32) {
    %c0_i32 = arith.constant 0 : i32
    %c0_i32_0 = arith.constant 0 : i32
    %c0_i32_1 = arith.constant 0 : i32
    return %c0_i32, %c0_i32_0 : i32, i32
  }
  func.func @transform_4(%arg0: i32) -> (i32, i32) {
    %c0_i32 = arith.constant 0 : i32
    %c0_i32_0 = arith.constant 0 : i32
    %c0_i32_1 = arith.constant 0 : i32
    return %c0_i32, %c0_i32_0 : i32, i32
  }
  func.func @transform_5(%arg0: i32) -> (i32, i32) {
    %c0_i32 = arith.constant 0 : i32
    %c0_i32_0 = arith.constant 0 : i32
    return %c0_i32, %arg0 : i32, i32
  }
}

</mosaic_0001>

<bundles_post_ra>
// kernel: nn_forecaster_forward.1
= control target key start
LH: loop header
LB: loop body
LE: loop exit
PB: predicated region body
PF: predicated region fallthrough
CT: control target
= control target key end

     0   :  { %s713_s0 = inlined_call_operand.vmem [shape: f32[8,300], index: 0, kind: input, shape index: {}]   ;;  %s714_s1 = inlined_call_operand.vmem [shape: f32[8,8], index: 1, kind: input, shape index: {}]   ;;  %s715_s2 = inlined_call_operand.vmem [shape: f32[8,1], index: 2, kind: input, shape index: {}]   ;;  %s716_s3 = inlined_call_operand.vmem [shape: f32[8,1], index: 3, kind: input, shape index: {}]   ;;  %s717_s4 = inlined_call_operand.<no memory space> [shape: f32[1,1], index: 4, kind: input, shape index: {}]   ;;  %s718_s5 = inlined_call_operand.hbm [shape: f32[1,300], index: 5, kind: output, shape index: {}]  }
   0x1   :  { %10 = sst [smem:[#allocation2]] %s717_s4 }
   0x2   :  { %11 = vsyncpa [#allocation4], 0 }
   0x3   :  { %13 = vsyncpa [#allocation4 + $0x1], 0  ;;  %s588_s20 = smov 0   ;;  %s590_s21 = smov 0  }
   0x4   :  { %s592_s22 = smov 0   ;;  %s594_s23 = smov 0  }
   0x5 LB: > { %s419_s4 = sadd.s32 4294967295, %s551_s23   ;;  %s420_s24 = sadd.s32 4294967294, %s551_s23   ;;  %s551_s23 = sphi %s594_s23, %s724_s23   ;;  %s547_s22 = sphi %s592_s22, %s723_s22   ;;  %s543_s21 = sphi %s590_s21, %s722_s21   ;;  %s539_s20 = sphi %s588_s20, %s721_s20  }
   0x6   : > { %s611_s25 = sadd.s32 1, %s551_s23   ;;  %s136_s26 = sadd.s32 1, %s547_s22 }
   0x7   : > { %s133_s27 = ssub.s32 %s551_s23, %s611_s25  ;;  %p146_p0 = scmp.ne.s32.totalorder %s547_s22, %s543_s21 }
   0x8   : > { %p134_p1 = scmp.eq.s32.totalorder %s133_s27, 0  ;;  %p147_p2 = scmp.eq.s32.totalorder %s419_s4, 1 }
   0x9   : > { %p152_p3 = scmp.ne.s32.totalorder %s543_s21, %s539_s20  ;;  %p153_p4 = scmp.eq.s32.totalorder %s420_s24, 1 }
   0xa   : > { %s621_s28 = scalar_select %p134_p1, %s547_s22, %s136_s26  }
   0xb   : > { %p623_p5 = por %p147_p2, %p146_p0  ;;  %p627_p6 = por %p153_p4, %p152_p3 }
   0xc   : > { %p423_p7 = scmp.ge.s32.totalorder %s551_s23, 1  ;;  %p200_p8 = scmp.lt.s32.totalorder %s551_s23, 3 }
   0xe   : > { %p201_p9 = pnand %p423_p7, %p200_p8 }
   0xf   : > { %s633_s6 = sshll.u32 (!%p201_p9), %s419_s4, 1  ;;  %s229_s18 = sand.u32 (!%p201_p9), 1, %s543_s21  }
  0x10   : > { %204 = sbr.rel (%p201_p9) target bundleno = 212 (0xd4), region = 40  ;;  %p237_p10 = scmp.lt.s32.totalorder (!%p201_p9), %s633_s6, 2 }
  0x11   : > { %s325_s19 = sld [smem:[#allocation2]] (!%p201_p9)  ;;  %s424_s4 = sshll.u32 (!%p201_p9), %s229_s18, 1 }
  0x12   : > { %s231_s24 = scalar_lea.vmem (!%p201_p9), [#allocation3], %s424_s4  ;;  %s654_s26 = scalar_lea.sflag (!%p201_p9), [#allocation4], %s229_s18 }
  0x15   : > { %v253_v0 = vld [vmem:[%s715_s2] sm:$0xff]  ;;  %v553_v1 = vmov 0   ;;  %s238_s9 = scalar_select %p237_p10, %s633_s6, 2  ;;  %vm259_vm0 = vcmask 64512   ;;  %v335_v29 = vlaneseq  ;;  %vm332_vm1 = vcmask 1040384  }
  0x16   : > { %473 = vset.pattern.permute.xlu0 %v553_v1  ;;  %v250_v2 = vld [vmem:[%s714_s1] sm:$0xff]  ;;  %s349_s27 = ssub.s32 (%p623_p5), 3, %s633_s6 }
  0x17   : > { %256 = vperm.xlu0 %473, %v253_v0   ;;  %s426_s10 = sshll.u32 %s238_s9, 3  ;;  %v305_v5 = vld [vmem:[%s716_s3] sm:$0xff]  ;;  %v326_v26 = vstv %s325_s19  ;;  %vm337_vm2 = vcmp.lt.s32.totalorder %v335_v29, 256  ;;  %p350_p11 = scmp.lt.s32.totalorder (%p623_p5), %s349_s27, 2 }
  0x18   : > { %s240_s13 = scalar_lea.vmem %s713_s0, %s426_s10 }
  0x19   : > { %v251_v3 = vld [vmem:[%s240_s13] sm:$0xff]  ;;  %v252_v4 = vld [vmem:[%s240_s13 + $0x8] sm:$0xff] }
  0x1a   : > { %278 = vmatpush.msra.mxu0 %v251_v3  ;;  %298 = vmatpush.msra.mxu1 %v252_v4 }
  0x1b   : > { %427 = vmatmul.msk.f32.vlgmr.msra.gmra.mxu0 %vm259_vm0, %v250_v2  ;;  %428 = vmatmul.msk.f32.vlgmr.msra.gmra.mxu1 %vm259_vm0, %v250_v2 }
  0x1f   : > { %308 = vperm.xlu0 %473, %v305_v5  }
  0x89   : > { %v257_v6 = vpop.permute.xlu0 %256 }
  0x91   : > { %v309_v12 = vpop.permute.xlu0 %308 }
  0x98   : > { %v280_v7 = vpop.f32.mrf.mxu0  ;;  %v300_v8 = vpop.f32.mrf.mxu1 }
  0x99   : > { %v281_v9 = vadd.f32 %v280_v7, %v257_v6  ;;  %v301_v10 = vadd.f32 %v300_v8, %v257_v6 }
  0x9b   : > { %474 = vtanh.f32 %v281_v9 }
  0x9c   : > { %476 = vtanh.f32 %v301_v10 }
  0xa1   : > { %v475_v11 = vpop.eup %474 }
  0xa2   : > { %v477_v13 = vpop.eup %476  ;;  %v311_v14 = vmul.f32 %v475_v11, %v309_v12 }
  0xa3   : > { %v312_v15 = vmul.f32 %v477_v13, %v309_v12 }
  0xa4   : > { %v313_v16 = vrot.slane %v311_v14, 4 }
  0xa5   : > { %v319_v17 = vrot.slane %v312_v15, 4 }
  0xa6   : > { %v314_v18 = vadd.f32 %v313_v16, %v311_v14 }
  0xa7   : > { %v320_v19 = vadd.f32 %v319_v17, %v312_v15 }
  0xa8   : > { %v315_v20 = vrot.slane %v314_v18, 2 }
  0xa9   : > { %v321_v21 = vrot.slane %v320_v19, 2 }
  0xaa   : > { %v316_v22 = vadd.f32 %v315_v20, %v314_v18 }
  0xab   : > { %v322_v23 = vadd.f32 %v321_v21, %v320_v19 }
  0xac   : > { %v317_v24 = vrot.slane %v316_v22, 1 }
  0xad   : > { %v323_v25 = vrot.slane %v322_v23, 1 }
  0xae   : > { %v318_v27 = vadd.f32 %v317_v24, %v316_v22 }
  0xaf   : > { %v324_v28 = vadd.f32 %v323_v25, %v322_v23 }
  0xb0   : > { %v327_v31 = vadd.f32 %v326_v26, %v318_v27 }
  0xb1   : > { %v328_v30 = vadd.f32 %v326_v26, %v324_v28 }
  0xb2   : > { %347 = sbr.rel (!%p623_p5) target bundleno = 212 (0xd4), region = 44 }
  0xb3   : > { %v331_v32 = vrot.slane %v328_v30, 7 }
  0xb5   : > { %v333_v33 = vsel %vm332_vm1, %v327_v31, %v331_v32 }
  0xb6   : > { %339 = vst.msk [vmem:[%s231_s24] sm:$0x3] %vm337_vm2, %v333_v33 }
  0xb7   : > { %s726_s27 = smov (!%p350_p11, %s349_s27), 2 }
  0xb8   : > { %s352_s7 = ssub.s32 2, %s726_s27 }
  0xb9   : > { %s353_s8 = sshll.u32 %s352_s7, 4 }
  0xba   : > { %354 = vsyncadd %s654_s26, %s353_s8  ;;  %p431_p12 = scmp.ne.s32.totalorder %s726_s27, 0  ;;  %s356_s29 = scalar_lea.hbm %s718_s5, %s633_s6 }
  0xbb   : > { %s357_s11 = sshll.u32 %s726_s27, 4  ;;  %s669_s12 = sshll.u32 %s231_s24, 4  ;;  %s359_s12 = int_to_ptr.vmem [resolvable:$true] %s669_s12 }
  0xbc   : > { %s672_s13 = sshll.u32 %s356_s29, 4  ;;  %s478_s14 = sshra.s32 %s359_s12, 4  ;;  %s361_s13 = int_to_ptr.hbm [resolvable:$true] %s672_s13  ;;  %s479_s14 = int_to_ptr.vmem [resolvable:$true] %s478_s14 }
  0xbd   : > { %s480_s15 = sshrl.u32 %s357_s11, 4  ;;  %s554_s6 = smov [#allocation3]  }
  0xbe   : > { %s485_s16 = scalar_lea.vmem %s479_s14, %s480_s15  ;;  %s489_s17 = scalar_lea.vmem %s554_s6, 4 }
  0xbf   : > { %p486_p13 = scmp.ne.s32.totalorder %s479_s14, %s485_s16  ;;  %p491_p2 = scmp.lt.s32.totalorder %s489_s17, %s485_s16 }
  0xc1   : > { %p487_p0 = pnand %p486_p13, %p431_p12 }
  0xc3   : > { %p488_p1 = pneg %p487_p0 }
  0xc5   : > { %p493_p3 = pnand %p491_p2, %p488_p1 }
  0xc7   : > { %496 = shalt.err (!%p493_p3)
}
  0xc8   : > { %s497_s18 = sshra.s32 %s361_s13, 4  ;;  %s508_s7 = scalar_lea.hbm %s718_s5, 3  ;;  %s498_s18 = int_to_ptr.hbm [resolvable:$true] %s497_s18 }
  0xc9   : > { %s504_s19 = scalar_lea.hbm %s498_s18, %s480_s15  ;;  %p509_p8 = scmp.lt.s32.totalorder %s498_s18, %s718_s5 }
  0xca   : > { %p505_p4 = scmp.ne.s32.totalorder %s498_s18, %s504_s19  ;;  %p510_p9 = scmp.lt.s32.totalorder %s508_s7, %s504_s19 }
  0xcc   : > { %p506_p5 = pnand %p505_p4, %p431_p12  ;;  %p511_p10 = por %p510_p9, %p509_p8 }
  0xce   : > { %p507_p7 = pneg %p506_p5 }
  0xd0   : > { %p512_p11 = pnand %p511_p10, %p507_p7 }
  0xd2   : > { %515 = shalt.err (!%p512_p11)
}
  0xd3   : > { %363 = dma.vmem_to_hbm [thread:$0]  (%p431_p12), %s359_s12, %s357_s11, %s361_s13, %s654_s26  }
  0xd4 PF: > { %p439_p13 = scmp.ge.s32.totalorder %s551_s23, 2  ;;  %s372_s10 = sand.u32 1, %s539_s20  }
  0xd5   : > { %s373_s29 = scalar_lea.sflag [#allocation4], %s372_s10 }
  0xd6   : > { %p436_p0 = pnand %p439_p13, %p627_p6 }
  0xd8   : > { %p437_p1 = pneg %p436_p0 }
  0xda   : > { %534 = dma.done.wait (%p437_p1), %s373_s29, 32  }
  0xdb   : > { %536 = vsyncadd (%p437_p1), %s373_s29, 4294967264  ;;  %p16_p2 = scmp.ge.s32.totalorder %s611_s25, 4   ;;  %s721_s20 = smov %s543_s21 }
  0xdc   : > { %s722_s21 = smov %s547_s22  ;;  %s723_s22 = smov %s621_s28 }
  0xdd   : > { %s724_s23 = smov %s611_s25  ;;  %18 = sbr.rel (!%p16_p2) target bundleno = 5 (0x5), region = 75 }
  0xe2   :  { %379 = vsyncpa [#allocation4], 1 }
  0xe3   :  { %381 = vsyncpa [#allocation4 + $0x1], 1 }

</bundles_post_ra>
